<compile_context>
chip_gen: v5e
topology: v5e:2x2
jax: 0.10.0
libtpu: 0.0.40
codegen_flags: <defaults>
</compile_context>

<pallas_src>
import jax
import jax.numpy as jnp
from jax.experimental import pallas as pl
from jax.experimental.pallas import tpu as pltpu


def _round_up(x, m):
    return ((x + m - 1) // m) * m


def gcn_kernel(x_ref, adj_ref, w_ref, b_ref, o_ref):
    """One (row-tile) invocation.

    x_ref   : (N, F_in)          bf16   node features (resident)
    adj_ref : (4, TILE_N, N)     bf16   row-tile of the 4 stacked adjacencies
    w_ref   : (F_in, 4*F_pad)    bf16   columns = [W1 | W2 | W3 | W4] (padded)
    b_ref   : (1, F_pad)         f32    = sum_k b_k (padded)
    o_ref   : (TILE_N, F_pad)    f32 (or bf16)
    """
    f_pad = o_ref.shape[1]

    # Stage 1: one fused MXU dot for all four supports x @ W_k (f32 acc).
    # Recomputed per row-tile in the gridded path; it is tiny (K = F_in).
    s = jnp.dot(x_ref[...], w_ref[...], preferred_element_type=jnp.float32)

    # Stage 2: four accumulating dots.  The s-slices are lane-aligned
    # (F_pad % 128 == 0) and stay in vregs -- no VMEM staging round trip.
    acc = jnp.zeros(o_ref.shape, jnp.float32)
    for k in range(4):
        s_k = s[:, k * f_pad:(k + 1) * f_pad].astype(adj_ref.dtype)
        acc = acc + jnp.dot(adj_ref[k], s_k, preferred_element_type=jnp.float32)

    # Hoisted bias: single broadcast-add in the epilogue.
    o_ref[...] = (acc + b_ref[...]).astype(o_ref.dtype)


def prepare_gcn_weights(w_stack, b_stack):
    """Pack the parameters once (reuse across calls / micro-batches).

    w_stack: (4, F_in, F_out), b_stack: (4, F_out)
    Returns (w_cat (F_in, 4*F_pad) bf16, b_sum (1, F_pad) f32, f_out).
    """
    _, f_in, f_out = w_stack.shape
    f_pad = max(128, _round_up(f_out, 128))
    w_padded = jnp.pad(w_stack, ((0, 0), (0, 0), (0, f_pad - f_out)))
    w_cat = jnp.transpose(w_padded, (1, 0, 2)).reshape(f_in, 4 * f_pad)
    w_cat = w_cat.astype(jnp.bfloat16)
    b_sum = jnp.pad(
        jnp.sum(b_stack.astype(jnp.float32), axis=0).reshape(1, f_out),
        ((0, 0), (0, f_pad - f_out)))
    return w_cat, b_sum, f_out


def prepare_adjacency(adj_stack):
    """Cast the constant (4, N, N) adjacency stack once per graph."""
    return adj_stack.astype(jnp.bfloat16)


def gcn_apply(x, adj_bf16, w_cat, b_sum, f_out, *,
              out_dtype=jnp.float32, tile_n=None):
    """Apply the GCN layer with pre-packed adjacency/weights."""
    n, f_in = x.shape
    f_pad = b_sum.shape[1]
    x_bf16 = x.astype(jnp.bfloat16)
    out_isz = jnp.dtype(out_dtype).itemsize

    flops = int(2 * n * f_in * 4 * f_pad + 4 * 2 * n * n * f_pad)
    bytes_accessed = int(x_bf16.size * 2 + adj_bf16.size * 2 + w_cat.size * 2
                         + b_sum.size * 4 + n * f_pad * out_isz)
    cost = pl.CostEstimate(flops=flops, transcendentals=0,
                           bytes_accessed=bytes_accessed)

    adj_bytes = 4 * n * n * 2  # bf16 adjacency stack

    if tile_n is None:
        # Whole-array residency is safe well below this across v5e/v6e/v7x
        # once the explicit vmem limit below is applied; beyond it, stream
        # adjacency row-tiles.
        tile_n = n if adj_bytes <= 24 * 1024 * 1024 else 512

    if tile_n >= n:
        # ---- gridless single-block path (small/medium N) -------------------
        vmem_needed = (x_bf16.size * 2 + adj_bf16.size * 2 + w_cat.size * 2
                       + b_sum.size * 4 + n * f_pad * out_isz
                       + 4 * n * f_pad)  # stage-1 result held in vregs/VMEM
        vmem_limit = int(min(max(2 * vmem_needed, 32 * 1024 * 1024),
                             100 * 1024 * 1024))
        out_padded = pl.pallas_call(
            gcn_kernel,
            out_shape=jax.ShapeDtypeStruct((n, f_pad), out_dtype),
            in_specs=[pl.BlockSpec(memory_space=pltpu.MemorySpace.VMEM)] * 4,
            out_specs=pl.BlockSpec(memory_space=pltpu.MemorySpace.VMEM),
            cost_estimate=cost,
            compiler_params=pltpu.CompilerParams(vmem_limit_bytes=vmem_limit),
        )(x_bf16, adj_bf16, w_cat, b_sum)
        return out_padded[:, :f_out]

    # ---- row-tiled grid path (large N) --------------------------------------
    tile_n = max(8, (min(tile_n, n) // 8) * 8)
    n_rows = _round_up(n, tile_n)
    if n_rows != n:
        adj_bf16 = jnp.pad(adj_bf16, ((0, 0), (0, n_rows - n), (0, 0)))
    grid = (n_rows // tile_n,)

    # Per-step double-buffered tiles + resident operands, with headroom.
    per_step = 2 * (4 * tile_n * n * 2 + tile_n * f_pad * out_isz)
    resident = x_bf16.size * 2 + w_cat.size * 2 + b_sum.size * 4 + 4 * n * f_pad
    vmem_limit = int(min(max(2 * (per_step + resident), 32 * 1024 * 1024),
                         100 * 1024 * 1024))

    out_padded = pl.pallas_call(
        gcn_kernel,
        out_shape=jax.ShapeDtypeStruct((n_rows, f_pad), out_dtype),
        grid=grid,
        in_specs=[
            pl.BlockSpec((n, f_in), lambda i: (0, 0)),           # x (resident)
            pl.BlockSpec((4, tile_n, n), lambda i: (0, i, 0)),   # adj row-tile
            pl.BlockSpec((f_in, 4 * f_pad), lambda i: (0, 0)),   # w (resident)
            pl.BlockSpec((1, f_pad), lambda i: (0, 0)),          # b (resident)
        ],
        out_specs=pl.BlockSpec((tile_n, f_pad), lambda i: (i, 0)),
        cost_estimate=cost,
        compiler_params=pltpu.CompilerParams(
            dimension_semantics=("parallel",),   # shards across TCs on v7x
            vmem_limit_bytes=vmem_limit),
    )(x_bf16, adj_bf16, w_cat, b_sum)
    return out_padded[:n, :f_out]


def graph_convolution(x, adj_stack, w_stack, b_stack, *,
                      out_dtype=jnp.float32, tile_n=None):
    """Convenience wrapper: x (N, F_in), adj_stack (4, N, N),
    w_stack (4, F_in, F_out), b_stack (4, F_out) -> (N, F_out)."""
    w_cat, b_sum, f_out = prepare_gcn_weights(w_stack, b_stack)
    adj_bf16 = prepare_adjacency(adj_stack)
    return gcn_apply(x, adj_bf16, w_cat, b_sum, f_out,
                     out_dtype=out_dtype, tile_n=tile_n)


def reference(x, adj_stack, w_stack, b_stack):
    """Pure-JAX f32 reference matching the PyTorch forward."""
    out = jnp.zeros((x.shape[0], w_stack.shape[-1]), jnp.float32)
    for k in range(4):
        out = out + adj_stack[k] @ (x @ w_stack[k]) + b_stack[k][None, :]
    return out


if __name__ == "__main__":
    # Small deterministic shapes consistent with the module's forward:
    # N graph nodes, F_IN input features, F_OUT output features.
    N, F_IN, F_OUT = 64, 32, 64

    key = jax.random.PRNGKey(0)
    kx, ka, kw, kb = jax.random.split(key, 4)

    x = jax.random.normal(kx, (N, F_IN), dtype=jnp.float32)
    adj_stack = jax.random.normal(ka, (4, N, N), dtype=jnp.float32)
    # Deterministic synthetic parameters (the PyTorch module leaves its
    # FloatTensors uninitialized, so any deterministic values are valid).
    w_stack = 0.05 * jax.random.normal(kw, (4, F_IN, F_OUT), dtype=jnp.float32)
    b_stack = 0.01 * jax.random.normal(kb, (4, F_OUT), dtype=jnp.float32)

    ref = reference(x, adj_stack, w_stack, b_stack)

    # Gridless single-block path (the one used at this toy size).
    out = graph_convolution(x, adj_stack, w_stack, b_stack)
    out = jax.block_until_ready(out)
    assert out.shape == (N, F_OUT)
    # Tolerance loosened vs. the f32 reference because the MXU consumes bf16
    # operands (f32 accumulation) and the stage-1 support is bf16-rounded.
    assert jnp.allclose(out, ref, atol=5e-2, rtol=5e-2), "mismatch (resident)"

    # Exercise the row-tiled grid path too (what large-N / v7x would use).
    out_tiled = graph_convolution(x, adj_stack, w_stack, b_stack, tile_n=32)
    out_tiled = jax.block_until_ready(out_tiled)
    assert out_tiled.shape == (N, F_OUT)
    assert jnp.allclose(out_tiled, ref, atol=5e-2, rtol=5e-2), "mismatch (tiled)"

    print("KERNEL_OK")
</pallas_src>

<mosaic_0001>
module attributes {stable_mosaic.version = 11 : i64} {
  func.func @gcn_kernel(%arg0: memref<64x32xbf16, #tpu.memory_space<vmem>>, %arg1: memref<4x64x64xbf16, #tpu.memory_space<vmem>>, %arg2: memref<32x512xbf16, #tpu.memory_space<vmem>>, %arg3: memref<1x128xf32, #tpu.memory_space<vmem>>, %arg4: memref<64x128xf32, #tpu.memory_space<vmem>>) attributes {dimension_semantics = [], scalar_prefetch = 0 : i64, scratch_operands = 0 : i64, tpu.core_type = #tpu.core_type<tc>} {
    %c0 = arith.constant 0 : index
    %c0_0 = arith.constant 0 : index
    %0 = vector.load %arg0[%c0, %c0_0] : memref<64x32xbf16, #tpu.memory_space<vmem>>, vector<64x32xbf16>
    %c0_1 = arith.constant 0 : index
    %c0_2 = arith.constant 0 : index
    %1 = vector.load %arg2[%c0_1, %c0_2] : memref<32x512xbf16, #tpu.memory_space<vmem>>, vector<32x512xbf16>
    %cst = arith.constant dense<0.000000e+00> : vector<64x512xf32>
    %2 = tpu.matmul %0, %1, %cst {dimension_numbers = #tpu.dot_dimension_numbers<[1], [0], [0], [1], [0, 0, 1, 1], [], []>} : vector<64x32xbf16>, vector<32x512xbf16>, vector<64x512xf32> -> vector<64x512xf32>
    %cst_3 = arith.constant 0.000000e+00 : f32
    %3 = vector.broadcast %cst_3 : f32 to vector<64x128xf32>
    %4 = vector.extract_strided_slice %2 {offsets = [0, 0], sizes = [64, 128], strides = [1, 1]} : vector<64x512xf32> to vector<64x128xf32>
    %5 = arith.truncf %4 : vector<64x128xf32> to vector<64x128xbf16>
    %c0_4 = arith.constant 0 : index
    %c0_5 = arith.constant 0 : index
    %c0_6 = arith.constant 0 : index
    %6 = vector.load %arg1[%c0_4, %c0_5, %c0_6] : memref<4x64x64xbf16, #tpu.memory_space<vmem>>, vector<1x64x64xbf16>
    %7 = vector.shape_cast %6 : vector<1x64x64xbf16> to vector<64x64xbf16>
    %cst_7 = arith.constant dense<0.000000e+00> : vector<64x128xf32>
    %8 = tpu.matmul %7, %5, %cst_7 {dimension_numbers = #tpu.dot_dimension_numbers<[1], [0], [0], [1], [0, 0, 1, 1], [], []>} : vector<64x64xbf16>, vector<64x128xbf16>, vector<64x128xf32> -> vector<64x128xf32>
    %9 = arith.addf %3, %8 : vector<64x128xf32>
    %10 = vector.extract_strided_slice %2 {offsets = [0, 128], sizes = [64, 128], strides = [1, 1]} : vector<64x512xf32> to vector<64x128xf32>
    %11 = arith.truncf %10 : vector<64x128xf32> to vector<64x128xbf16>
    %c1 = arith.constant 1 : index
    %c0_8 = arith.constant 0 : index
    %c0_9 = arith.constant 0 : index
    %12 = vector.load %arg1[%c1, %c0_8, %c0_9] : memref<4x64x64xbf16, #tpu.memory_space<vmem>>, vector<1x64x64xbf16>
    %13 = vector.shape_cast %12 : vector<1x64x64xbf16> to vector<64x64xbf16>
    %cst_10 = arith.constant dense<0.000000e+00> : vector<64x128xf32>
    %14 = tpu.matmul %13, %11, %cst_10 {dimension_numbers = #tpu.dot_dimension_numbers<[1], [0], [0], [1], [0, 0, 1, 1], [], []>} : vector<64x64xbf16>, vector<64x128xbf16>, vector<64x128xf32> -> vector<64x128xf32>
    %15 = arith.addf %9, %14 : vector<64x128xf32>
    %16 = vector.extract_strided_slice %2 {offsets = [0, 256], sizes = [64, 128], strides = [1, 1]} : vector<64x512xf32> to vector<64x128xf32>
    %17 = arith.truncf %16 : vector<64x128xf32> to vector<64x128xbf16>
    %c2 = arith.constant 2 : index
    %c0_11 = arith.constant 0 : index
    %c0_12 = arith.constant 0 : index
    %18 = vector.load %arg1[%c2, %c0_11, %c0_12] : memref<4x64x64xbf16, #tpu.memory_space<vmem>>, vector<1x64x64xbf16>
    %19 = vector.shape_cast %18 : vector<1x64x64xbf16> to vector<64x64xbf16>
    %cst_13 = arith.constant dense<0.000000e+00> : vector<64x128xf32>
    %20 = tpu.matmul %19, %17, %cst_13 {dimension_numbers = #tpu.dot_dimension_numbers<[1], [0], [0], [1], [0, 0, 1, 1], [], []>} : vector<64x64xbf16>, vector<64x128xbf16>, vector<64x128xf32> -> vector<64x128xf32>
    %21 = arith.addf %15, %20 : vector<64x128xf32>
    %22 = vector.extract_strided_slice %2 {offsets = [0, 384], sizes = [64, 128], strides = [1, 1]} : vector<64x512xf32> to vector<64x128xf32>
    %23 = arith.truncf %22 : vector<64x128xf32> to vector<64x128xbf16>
    %c3 = arith.constant 3 : index
    %c0_14 = arith.constant 0 : index
    %c0_15 = arith.constant 0 : index
    %24 = vector.load %arg1[%c3, %c0_14, %c0_15] : memref<4x64x64xbf16, #tpu.memory_space<vmem>>, vector<1x64x64xbf16>
    %25 = vector.shape_cast %24 : vector<1x64x64xbf16> to vector<64x64xbf16>
    %cst_16 = arith.constant dense<0.000000e+00> : vector<64x128xf32>
    %26 = tpu.matmul %25, %23, %cst_16 {dimension_numbers = #tpu.dot_dimension_numbers<[1], [0], [0], [1], [0, 0, 1, 1], [], []>} : vector<64x64xbf16>, vector<64x128xbf16>, vector<64x128xf32> -> vector<64x128xf32>
    %27 = arith.addf %21, %26 : vector<64x128xf32>
    %c0_17 = arith.constant 0 : index
    %c0_18 = arith.constant 0 : index
    %28 = vector.load %arg3[%c0_17, %c0_18] : memref<1x128xf32, #tpu.memory_space<vmem>>, vector<1x128xf32>
    %29 = vector.broadcast %28 : vector<1x128xf32> to vector<64x128xf32>
    %30 = arith.addf %27, %29 : vector<64x128xf32>
    %c0_19 = arith.constant 0 : index
    %c0_20 = arith.constant 0 : index
    %31 = vector.load %arg4[%c0_19, %c0_20] : memref<64x128xf32, #tpu.memory_space<vmem>>, vector<64x128xf32>
    tpu.vector_store %arg4[%c0_19, %c0_20], %30 {strides = array<i32>} : memref<64x128xf32, #tpu.memory_space<vmem>>, vector<64x128xf32>,
    return
  }
}

</mosaic_0001>

<bundles_post_ra>
// kernel: tpu_custom_call.1
= control target key start
LH: loop header
LB: loop body
LE: loop exit
PB: predicated region body
PF: predicated region fallthrough
CT: control target
= control target key end

     0   :  { %9 = vsyncpa [#allocation3], 0  ;;  %s977_s0 = inlined_call_operand.vmem [shape: bf16[64,32], index: 0, kind: input, shape index: {}]   ;;  %s978_s1 = inlined_call_operand.hbm [shape: bf16[4,64,64], index: 1, kind: input, shape index: {}]   ;;  %s979_s2 = inlined_call_operand.hbm [shape: bf16[32,512], index: 2, kind: input, shape index: {}]   ;;  %s980_s3 = inlined_call_operand.vmem [shape: f32[1,128], index: 3, kind: input, shape index: {}]   ;;  %s981_s4 = inlined_call_operand.hbm [shape: f32[64,128], index: 4, kind: output, shape index: {}]  }
   0x1   :  { %10 = vsyncpa [#allocation6], 0 }
   0x2   :  { %11 = vsyncpa [#allocation4], 0  ;;  %s18_s17 = sshll.u32 %s978_s1, 4  ;;  %s868_s18 = smov [#allocation2]   ;;  %s19_s17 = int_to_ptr.hbm [resolvable:$true] %s18_s17 }
   0x3   :  { %s20_s19 = sshll.u32 %s868_s18, 4  ;;  %s31_s22 = sshll.u32 %s979_s2, 4  ;;  %s21_s19 = int_to_ptr.vmem [resolvable:$true] %s20_s19  ;;  %s32_s22 = int_to_ptr.hbm [resolvable:$true] %s31_s22 }
   0x4   :  { %s869_s23 = smov 64   ;;  %s870_s24 = smov 4  }
   0x5   :  { %26 = dma.hbm_to_vmem [thread:$0]  %s19_s17, 2048, %s21_s19, [#allocation3], %s869_s23, %s869_s23, %s870_s24  }
   0x6   :  { %s871_s25 = smov [#allocation5]   ;;  %s872_s27 = smov 256  }
   0x7   :  { %s33_s26 = sshll.u32 %s871_s25, 4  ;;  %s873_s28 = smov 16   ;;  %s34_s26 = int_to_ptr.vmem [resolvable:$true] %s33_s26 }
   0x8   :  { %39 = dma.hbm_to_vmem [thread:$0]  %s32_s22, 1024, %s34_s26, [#allocation6], %s872_s27, %s872_s27, %s873_s28  }
   0x9   :  { %862 = dma.done.wait [#allocation3], 2048  }
   0xa   :  { %863 = vsyncadd [#allocation3], 4294965248 }
   0xb   :  { %864 = dma.done.wait [#allocation6], 1024  }
   0xc   :  { %865 = vsyncadd [#allocation6], 4294966272  ;;  %v642_v0 = vld [vmem:[#allocation5 + $0x20] sm:$0xf]  ;;  %v762_v1 = vld [vmem:[#allocation5 + $0x2c] sm:$0xf0] }
   0xd   :  { %v760_v2 = vld [vmem:[#allocation5 + $0x24] sm:$0xf]  ;;  %v643_v3 = vor.u32 %v762_v1, %v642_v0  ;;  %v644_v4 = vld [vmem:[#allocation5 + $0x30] sm:$0xf0]  ;;  %v650_v5 = vld [vmem:[#allocation5 + $0x28] sm:$0xf] }
   0xe   :  { %v763_v6 = vld [vmem:[#allocation5 + $0x34] sm:$0xf0]  ;;  %v647_v7 = vor.u32 %v760_v2, %v644_v4  ;;  %v761_v9 = vld [vmem:[#allocation5 + $0x2c] sm:$0xf]  ;;  %v652_v10 = vld [vmem:[#allocation5 + $0x38] sm:$0xf0] }
   0xf   :  { %v651_v8 = vor.u32 %v763_v6, %v650_v5  ;;  %v626_v11 = vld [vmem:[#allocation5] sm:$0xf]  ;;  %146 = vmatpush.bf16.msra.mxu0 %v643_v3  ;;  %v655_v12 = vor.u32 %v761_v9, %v652_v10  ;;  %v758_v13 = vld [vmem:[#allocation5 + $0xc] sm:$0xf0]  ;;  %v756_v14 = vld [vmem:[#allocation5 + $0x4] sm:$0xf] }
  0x10   :  { %v628_v15 = vld [vmem:[#allocation5 + $0x10] sm:$0xf0]  ;;  %175 = vmatpush.bf16.msra.mxu1 %v647_v7  ;;  %v627_v16 = vor.u32 %v758_v13, %v626_v11  ;;  %v634_v18 = vld [vmem:[#allocation5 + $0x8] sm:$0xf]  ;;  %v759_v19 = vld [vmem:[#allocation5 + $0x14] sm:$0xf0] }
  0x11   :  { %204 = vmatpush.bf16.msra.mxu2 %v651_v8  ;;  %v631_v17 = vor.u32 %v756_v14, %v628_v15  ;;  %v757_v20 = vld [vmem:[#allocation5 + $0xc] sm:$0xf]  ;;  %233 = vmatpush.bf16.msra.mxu3 %v655_v12  ;;  %v635_v21 = vor.u32 %v759_v19, %v634_v18  ;;  %v636_v22 = vld [vmem:[#allocation5 + $0x18] sm:$0xf0]  ;;  %v752_v24 = vld [vmem:[%s977_s0] sm:$0xff]  ;;  %vm127_vm0 = vcmask 261120  }
  0x12   :  { %v639_v23 = vor.u32 %v757_v20, %v636_v22  ;;  %v753_v25 = vld [vmem:[%s977_s0 + $0x8] sm:$0xff]  ;;  %v754_v26 = vld [vmem:[%s977_s0 + $0x10] sm:$0xff]  ;;  %v755_v27 = vld [vmem:[%s977_s0 + $0x18] sm:$0xff]  ;;  %vm301_vm1 = vcmask 523264   ;;  %s594_s13 = sshll.u32 %s981_s4, 4  ;;  %s875_s14 = smov 128   ;;  %s595_s13 = int_to_ptr.hbm [resolvable:$true] %s594_s13 }
  0x13   :  { %147 = vmatpush.bf16.msra.mxu0 %v627_v16  ;;  %v764_v8 = vld [vmem:[#allocation2] sm:$0xff]  ;;  %v765_v16 = vld [vmem:[#allocation2 + $0x8] sm:$0xff]  ;;  %v766_v20 = vld [vmem:[#allocation2 + $0x10] sm:$0xff]  ;;  %s876_s15 = smov 8  }
  0x14   :  { %176 = vmatpush.bf16.msra.mxu1 %v631_v17  ;;  %v768_v9 = vld [vmem:[#allocation2 + $0x20] sm:$0xff]  ;;  %v769_v17 = vld [vmem:[#allocation2 + $0x28] sm:$0xff]  ;;  %v774_v22 = vld [vmem:[#allocation2 + $0x50] sm:$0xff] }
  0x15   :  { %205 = vmatpush.bf16.msra.mxu2 %v635_v21  ;;  %234 = vmatpush.bf16.msra.mxu3 %v639_v23  ;;  %v772_v14 = vld [vmem:[#allocation2 + $0x40] sm:$0xff]  ;;  %v773_v18 = vld [vmem:[#allocation2 + $0x48] sm:$0xff]  ;;  %v770_v21 = vld [vmem:[#allocation2 + $0x30] sm:$0xff] }
  0x16   :  { %656 = vmatmul.msk.bf16.vlgmr.msra.gmra.mxu0 %vm127_vm0, %v752_v24  ;;  %v776_v15 = vld [vmem:[#allocation2 + $0x60] sm:$0xff]  ;;  %v777_v19 = vld [vmem:[#allocation2 + $0x68] sm:$0xff]  ;;  %v778_v23 = vld [vmem:[#allocation2 + $0x70] sm:$0xff] }
  0x17   :  { %660 = vmatmul.msk.bf16.vlgmr.msra.gmra.mxu1 %vm127_vm0, %v752_v24 }
  0x18   :  { %664 = vmatmul.msk.bf16.vlgmr.msra.gmra.mxu2 %vm127_vm0, %v752_v24  ;;  %668 = vmatmul.msk.bf16.vlgmr.msra.gmra.mxu3 %vm127_vm0, %v752_v24  ;;  %v767_v24 = vld [vmem:[#allocation2 + $0x18] sm:$0xff] }
  0x26   :  { %657 = vmatmul.msk.bf16.gmra.mxu0 %vm127_vm0, %v753_v25 }
  0x27   :  { %661 = vmatmul.msk.bf16.gmra.mxu1 %vm127_vm0, %v753_v25 }
  0x28   :  { %665 = vmatmul.msk.bf16.gmra.mxu2 %vm127_vm0, %v753_v25  ;;  %669 = vmatmul.msk.bf16.gmra.mxu3 %vm127_vm0, %v753_v25  ;;  %v771_v25 = vld [vmem:[#allocation2 + $0x38] sm:$0xff] }
  0x36   :  { %658 = vmatmul.msk.bf16.gmra.mxu0 %vm127_vm0, %v754_v26 }
  0x37   :  { %662 = vmatmul.msk.bf16.gmra.mxu1 %vm127_vm0, %v754_v26 }
  0x38   :  { %666 = vmatmul.msk.bf16.gmra.mxu2 %vm127_vm0, %v754_v26  ;;  %670 = vmatmul.msk.bf16.gmra.mxu3 %vm127_vm0, %v754_v26  ;;  %v775_v26 = vld [vmem:[#allocation2 + $0x58] sm:$0xff] }
  0x46   :  { %659 = vmatmul.msk.bf16.gmra.mxu0 %vm127_vm0, %v755_v27 }
  0x47   :  { %663 = vmatmul.msk.bf16.gmra.mxu1 %vm127_vm0, %v755_v27 }
  0x48   :  { %667 = vmatmul.msk.bf16.gmra.mxu2 %vm127_vm0, %v755_v27  ;;  %671 = vmatmul.msk.bf16.gmra.mxu3 %vm127_vm0, %v755_v27  ;;  %v779_v27 = vld [vmem:[#allocation2 + $0x78] sm:$0xff] }
  0x93   :  { %v149_v28 = vpop.f32.mrf.mxu0 }
  0x94   :  { %v178_v29 = vpop.f32.mrf.mxu1 }
  0x9b   :  { %v936_v30 = vpop.f32.mrf.mxu2  ;;  %v938_v31 = vpop.f32.mrf.mxu3 }
  0x9c   :  { %v151_v32 = vpop.f32.mrf.mxu0  ;;  %v180_v33 = vpop.f32.mrf.mxu1 }
  0x9d   :  { %v256_v5 = vpack.c.bf16 %v151_v32, %v149_v28  ;;  %v268_v7 = vpack.c.bf16 %v180_v33, %v178_v29 }
  0xa3   :  { %v209_v34 = vpop.f32.mrf.mxu2  ;;  %v940_v35 = vpop.f32.mrf.mxu3 }
  0xa4   :  { %v154_v36 = vpop.f32.mrf.mxu0  ;;  %v183_v37 = vpop.f32.mrf.mxu1  ;;  %v404_v12 = vpack.c.bf16 %v209_v34, %v936_v30  ;;  %v486_v13 = vpack.c.bf16 %v940_v35, %v938_v31 }
  0xab   :  { %v212_v38 = vpop.f32.mrf.mxu2  ;;  %v241_v39 = vpop.f32.mrf.mxu3 }
  0xac   :  { %v156_v40 = vpop.f32.mrf.mxu0  ;;  %v185_v41 = vpop.f32.mrf.mxu1 }
  0xad   :  { %v257_v1 = vpack.c.bf16 %v156_v40, %v154_v36  ;;  %v269_v3 = vpack.c.bf16 %v185_v41, %v183_v37  ;;  %v964_v36 = vld [vmem:[%s980_s3] ss:$0 sm:$0xff]  ;;  %s874_s3 = smov [#allocation7]  }
  0xae   :  { %s592_s10 = sshll.u32 %s874_s3, 4  ;;  %s593_s10 = int_to_ptr.vmem [resolvable:$true] %s592_s10 }
  0xb3   :  { %v214_v42 = vpop.f32.mrf.mxu2  ;;  %v243_v43 = vpop.f32.mrf.mxu3 }
  0xb4   :  { %v159_v44 = vpop.f32.mrf.mxu0  ;;  %v188_v45 = vpop.f32.mrf.mxu1  ;;  %v405_v10 = vpack.c.bf16 %v214_v42, %v212_v38  ;;  %v487_v11 = vpack.c.bf16 %v243_v43, %v241_v39 }
  0xbb   :  { %v217_v46 = vpop.f32.mrf.mxu2  ;;  %v246_v47 = vpop.f32.mrf.mxu3 }
  0xbc   :  { %v161_v48 = vpop.f32.mrf.mxu0  ;;  %v190_v49 = vpop.f32.mrf.mxu1 }
  0xbd   :  { %v258_v60 = vpack.c.bf16 %v161_v48, %v159_v44  ;;  %v270_v61 = vpack.c.bf16 %v190_v49, %v188_v45 }
  0xc3   :  { %v219_v50 = vpop.f32.mrf.mxu2  ;;  %v248_v51 = vpop.f32.mrf.mxu3 }
  0xc4   :  { %v164_v52 = vpop.f32.mrf.mxu0  ;;  %v193_v53 = vpop.f32.mrf.mxu1  ;;  %v406_v4 = vpack.c.bf16 %v219_v50, %v217_v46  ;;  %v488_v6 = vpack.c.bf16 %v248_v51, %v246_v47 }
  0xcb   :  { %v222_v54 = vpop.f32.mrf.mxu2  ;;  %v251_v55 = vpop.f32.mrf.mxu3 }
  0xcc   :  { %v166_v56 = vpop.f32.mrf.mxu0  ;;  %v195_v58 = vpop.f32.mrf.mxu1 }
  0xcd   :  { %v259_v57 = vpack.c.bf16 %v166_v56, %v164_v52  ;;  %v271_v59 = vpack.c.bf16 %v195_v58, %v193_v53 }
  0xcf   :  { %379 = vmatpush.bf16.msrb.mxu1 %v259_v57  ;;  %318 = vmatpush.bf16.msrb.mxu0 %v271_v59 }
  0xd3   :  { %v224_v62 = vpop.f32.mrf.mxu2  ;;  %380 = vmatpush.bf16.msrb.mxu1 %v258_v60  ;;  %v253_v0 = vpop.f32.mrf.mxu3  ;;  %319 = vmatpush.bf16.msrb.mxu0 %v270_v61 }
  0xd4   :  { %v407_v63 = vpack.c.bf16 %v224_v62, %v222_v54  ;;  %v489_v2 = vpack.c.bf16 %v253_v0, %v251_v55 }
  0xd6   :  { %453 = vmatpush.bf16.msrb.mxu2 %v407_v63  ;;  %535 = vmatpush.bf16.msrb.mxu3 %v489_v2 }
  0xd7   :  { %381 = vmatpush.bf16.msrb.mxu1 %v257_v1  ;;  %320 = vmatpush.bf16.msrb.mxu0 %v269_v3 }
  0xda   :  { %454 = vmatpush.bf16.msrb.mxu2 %v406_v4  ;;  %536 = vmatpush.bf16.msrb.mxu3 %v488_v6 }
  0xdb   :  { %382 = vmatpush.bf16.msrb.mxu1 %v256_v5  ;;  %321 = vmatpush.bf16.msrb.mxu0 %v268_v7 }
  0xde   :  { %455 = vmatpush.bf16.msrb.mxu2 %v405_v10  ;;  %708 = vmatmul.msk.bf16.vlgmr.msrb.gmra.mxu1 %vm301_vm1, %v764_v8 }
  0xdf   :  { %537 = vmatpush.bf16.msrb.mxu3 %v487_v11  ;;  %688 = vmatmul.msk.bf16.vlgmr.msrb.gmra.mxu0 %vm301_vm1, %v768_v9 }
  0xe2   :  { %456 = vmatpush.bf16.msrb.mxu2 %v404_v12 }
  0xe3   :  { %538 = vmatpush.bf16.msrb.mxu3 %v486_v13 }
  0xe5   :  { %728 = vmatmul.msk.bf16.vlgmr.msrb.gmra.mxu2 %vm301_vm1, %v772_v14 }
  0xe6   :  { %748 = vmatmul.msk.bf16.vlgmr.msrb.gmra.mxu3 %vm301_vm1, %v776_v15 }
  0xee   :  { %709 = vmatmul.msk.bf16.gmra.mxu1 %vm301_vm1, %v765_v16 }
  0xef   :  { %689 = vmatmul.msk.bf16.gmra.mxu0 %vm301_vm1, %v769_v17 }
  0xf5   :  { %729 = vmatmul.msk.bf16.gmra.mxu2 %vm301_vm1, %v773_v18 }
  0xf6   :  { %749 = vmatmul.msk.bf16.gmra.mxu3 %vm301_vm1, %v777_v19 }
  0xfe   :  { %710 = vmatmul.msk.bf16.gmra.mxu1 %vm301_vm1, %v766_v20 }
  0xff   :  { %690 = vmatmul.msk.bf16.gmra.mxu0 %vm301_vm1, %v770_v21 }
 0x105   :  { %730 = vmatmul.msk.bf16.gmra.mxu2 %vm301_vm1, %v774_v22 }
 0x106   :  { %750 = vmatmul.msk.bf16.gmra.mxu3 %vm301_vm1, %v778_v23 }
 0x10e   :  { %711 = vmatmul.msk.bf16.gmra.mxu1 %vm301_vm1, %v767_v24 }
 0x10f   :  { %691 = vmatmul.msk.bf16.gmra.mxu0 %vm301_vm1, %v771_v25 }
 0x115   :  { %731 = vmatmul.msk.bf16.gmra.mxu2 %vm301_vm1, %v775_v26 }
 0x116   :  { %751 = vmatmul.msk.bf16.gmra.mxu3 %vm301_vm1, %v779_v27 }
 0x15b   :  { %v384_v28 = vpop.f32.mrf.mxu1 }
 0x15c   :  { %v323_v29 = vpop.f32.mrf.mxu0 }
 0x15d   :  { %v385_v32 = vadd.f32 %v384_v28, %v323_v29 }
 0x163   :  { %v386_v30 = vpop.f32.mrf.mxu1 }
 0x164   :  { %v325_v31 = vpop.f32.mrf.mxu0 }
 0x165   :  { %v387_v41 = vadd.f32 %v386_v30, %v325_v31 }
 0x168   :  { %v458_v33 = vpop.f32.mrf.mxu2 }
 0x169   :  { %v478_v34 = vadd.f32 %v458_v33, %v385_v32  ;;  %v540_v35 = vpop.f32.mrf.mxu3 }
 0x16b   :  { %v560_v37 = vadd.f32 %v540_v35, %v478_v34  ;;  %v389_v38 = vpop.f32.mrf.mxu1 }
 0x16c   :  { %v328_v39 = vpop.f32.mrf.mxu0 }
 0x16d   :  { %v572_v40 = vadd.f32 %v964_v36, %v560_v37  ;;  %v390_v49 = vadd.f32 %v389_v38, %v328_v39 }
 0x16f   :  { %580 = vst [vmem:[#allocation7] sm:$0xff] %v572_v40 }
 0x170   :  { %v460_v42 = vpop.f32.mrf.mxu2 }
 0x171   :  { %v479_v43 = vadd.f32 %v460_v42, %v387_v41  ;;  %v542_v44 = vpop.f32.mrf.mxu3 }
 0x173   :  { %v561_v45 = vadd.f32 %v542_v44, %v479_v43  ;;  %v391_v46 = vpop.f32.mrf.mxu1 }
 0x174   :  { %v330_v47 = vpop.f32.mrf.mxu0 }
 0x175   :  { %v573_v48 = vadd.f32 %v964_v36, %v561_v45  ;;  %v392_v57 = vadd.f32 %v391_v46, %v330_v47 }
 0x177   :  { %581 = vst [vmem:[#allocation7 + $0x8] sm:$0xff] %v573_v48 }
 0x178   :  { %v463_v50 = vpop.f32.mrf.mxu2 }
 0x179   :  { %v480_v51 = vadd.f32 %v463_v50, %v390_v49  ;;  %v545_v52 = vpop.f32.mrf.mxu3 }
 0x17b   :  { %v562_v53 = vadd.f32 %v545_v52, %v480_v51  ;;  %v394_v55 = vpop.f32.mrf.mxu1 }
 0x17c   :  { %v333_v56 = vpop.f32.mrf.mxu0 }
 0x17d   :  { %v574_v54 = vadd.f32 %v964_v36, %v562_v53  ;;  %v395_v63 = vadd.f32 %v394_v55, %v333_v56 }
 0x17f   :  { %582 = vst [vmem:[#allocation7 + $0x10] sm:$0xff] %v574_v54 }
 0x180   :  { %v465_v58 = vpop.f32.mrf.mxu2 }
 0x181   :  { %v481_v59 = vadd.f32 %v465_v58, %v392_v57  ;;  %v547_v60 = vpop.f32.mrf.mxu3 }
 0x183   :  { %v563_v61 = vadd.f32 %v547_v60, %v481_v59  ;;  %v396_v0 = vpop.f32.mrf.mxu1 }
 0x184   :  { %v335_v2 = vpop.f32.mrf.mxu0 }
 0x185   :  { %v575_v62 = vadd.f32 %v964_v36, %v563_v61  ;;  %v397_v7 = vadd.f32 %v396_v0, %v335_v2 }
 0x187   :  { %583 = vst [vmem:[#allocation7 + $0x18] sm:$0xff] %v575_v62 }
 0x188   :  { %v468_v1 = vpop.f32.mrf.mxu2 }
 0x189   :  { %v482_v3 = vadd.f32 %v468_v1, %v395_v63  ;;  %v550_v4 = vpop.f32.mrf.mxu3 }
 0x18b   :  { %v564_v5 = vadd.f32 %v550_v4, %v482_v3  ;;  %v399_v12 = vpop.f32.mrf.mxu1 }
 0x18c   :  { %v338_v11 = vpop.f32.mrf.mxu0 }
 0x18d   :  { %v576_v6 = vadd.f32 %v964_v36, %v564_v5  ;;  %v400_v15 = vadd.f32 %v399_v12, %v338_v11 }
 0x18f   :  { %584 = vst [vmem:[#allocation7 + $0x20] sm:$0xff] %v576_v6 }
 0x190   :  { %v470_v8 = vpop.f32.mrf.mxu2 }
 0x191   :  { %v483_v9 = vadd.f32 %v470_v8, %v397_v7  ;;  %v552_v10 = vpop.f32.mrf.mxu3 }
 0x193   :  { %v565_v13 = vadd.f32 %v552_v10, %v483_v9  ;;  %v401_v21 = vpop.f32.mrf.mxu1 }
 0x194   :  { %v340_v20 = vpop.f32.mrf.mxu0 }
 0x195   :  { %v577_v14 = vadd.f32 %v964_v36, %v565_v13  ;;  %v402_v23 = vadd.f32 %v401_v21, %v340_v20 }
 0x197   :  { %585 = vst [vmem:[#allocation7 + $0x28] sm:$0xff] %v577_v14 }
 0x198   :  { %v473_v16 = vpop.f32.mrf.mxu2 }
 0x199   :  { %v484_v17 = vadd.f32 %v473_v16, %v400_v15  ;;  %v555_v18 = vpop.f32.mrf.mxu3 }
 0x19b   :  { %v566_v19 = vadd.f32 %v555_v18, %v484_v17 }
 0x19d   :  { %v578_v22 = vadd.f32 %v964_v36, %v566_v19 }
 0x19f   :  { %586 = vst [vmem:[#allocation7 + $0x30] sm:$0xff] %v578_v22 }
 0x1a0   :  { %v475_v24 = vpop.f32.mrf.mxu2 }
 0x1a1   :  { %v485_v25 = vadd.f32 %v475_v24, %v402_v23  ;;  %v557_v26 = vpop.f32.mrf.mxu3 }
 0x1a3   :  { %v567_v27 = vadd.f32 %v557_v26, %v485_v25 }
 0x1a5   :  { %v579_v28 = vadd.f32 %v964_v36, %v567_v27 }
 0x1a7   :  { %587 = vst [vmem:[#allocation7 + $0x38] sm:$0xff] %v579_v28 }
 0x1a8   :  { %600 = dma.vmem_to_hbm [thread:$0]  %s593_s10, 1024, %s595_s13, [#allocation4], %s875_s14, %s875_s14, %s876_s15  }
 0x1a9   :  { %866 = dma.done.wait [#allocation4], 1024  }
 0x1aa   :  { %867 = vsyncadd [#allocation4], 4294966272 }
 0x1ab   :  { %605 = vsyncpa [#allocation3], 1 }
 0x1ac   :  { %606 = vsyncpa [#allocation6], 1 }
 0x1ad   :  { %607 = vsyncpa [#allocation4], 1 }

</bundles_post_ra>
